<compile_context>
chip_gen: v6e
topology: v6e:2x2x1
jax: 0.10.0
libtpu: 0.0.40
codegen_flags: <defaults>
</compile_context>

<pallas_src>
import jax
import jax.numpy as jnp
from jax.experimental import pallas as pl
from jax.experimental.pallas import tpu as pltpu


def _loc_loss_kernel(prd_ref, tar_ref, ifunc_ref, out_ref):
    # prd_ref / tar_ref: (Bt, 4, HWp)   ifunc_ref: (Bt, 1, HWp)
    # out_ref: (1, Bt, 2)  -> [..., 0] = loss_sum, [..., 1] = ifunc_sum
    prd = prd_ref[...].astype(jnp.float32)          # (Bt, 4, HWp)
    tar = tar_ref[...].astype(jnp.float32)
    mask = ifunc_ref[:, 0, :].astype(jnp.float32)   # (Bt, HWp), values in {0,1}

    l_tar, t_tar, r_tar, b_tar = tar[:, 0, :], tar[:, 1, :], tar[:, 2, :], tar[:, 3, :]
    l_prd, t_prd, r_prd, b_prd = prd[:, 0, :], prd[:, 1, :], prd[:, 2, :], prd[:, 3, :]

    tar_area = (t_tar + b_tar) * (l_tar + r_tar)
    prd_area = (t_prd + b_prd) * (l_prd + r_prd)
    inter_h = jnp.minimum(t_prd, t_tar) + jnp.minimum(b_prd, b_tar)
    inter_w = jnp.minimum(l_prd, l_tar) + jnp.minimum(r_prd, r_tar)
    inter = inter_h * inter_w
    union = tar_area + prd_area - inter

    # -log(iou) = log(union) - log(inter); drop the divide and guard the logs
    # so masked-out / padded positions see 1.0 (log -> 0) and never NaN/Inf.
    valid = mask > 0.0
    safe_inter = jnp.where(valid, inter, 1.0)
    safe_union = jnp.where(valid, union, 1.0)
    iou_loss = mask * (jnp.log(safe_union) - jnp.log(safe_inter))

    loss_sum = jnp.sum(iou_loss, axis=-1, keepdims=True)   # (Bt, 1) lane reduce (XLU)
    ifunc_sum = jnp.sum(mask, axis=-1, keepdims=True)      # (Bt, 1)
    out_ref[0] = jnp.concatenate([loss_sum, ifunc_sum], axis=-1)   # single store


def loc_loss(loc_prd, loc_tar, ifunc):
    """loc_prd, loc_tar: (B, 4, H, W) float32/bfloat16; ifunc: (B, H, W) bool/float."""
    B, C, H, W = loc_prd.shape
    assert C == 4
    HW = H * W
    HWp = ((HW + 127) // 128) * 128              # lane-dense spatial axis

    # Bt samples per grid step (fills sublanes), but keep >= 2 grid steps when
    # B >= 2 so the parallel grid axis can shard across v7x's 2 TensorCores.
    Bt = 1 if B <= 1 else min(8, (B + 1) // 2)
    G = (B + Bt - 1) // Bt
    Bp = G * Bt

    prd = loc_prd.reshape(B, 4, HW)               # contiguous reshape: free
    tar = loc_tar.reshape(B, 4, HW)
    mask = ifunc.astype(jnp.float32).reshape(B, 1, HW)

    # Pad: prd/tar with 1.0 (benign boxes), ifunc with 0.0 so padded lanes and
    # padded samples contribute exactly 0 to both sums (logs are guarded too).
    if Bp != B or HWp != HW:
        prd = jnp.pad(prd, ((0, Bp - B), (0, 0), (0, HWp - HW)), constant_values=1.0)
        tar = jnp.pad(tar, ((0, Bp - B), (0, 0), (0, HWp - HW)), constant_values=1.0)
        mask = jnp.pad(mask, ((0, Bp - B), (0, 0), (0, HWp - HW)), constant_values=0.0)

    sums = pl.pallas_call(
        _loc_loss_kernel,
        out_shape=jax.ShapeDtypeStruct((G, Bt, 2), jnp.float32),
        grid_spec=pltpu.PrefetchScalarGridSpec(
            num_scalar_prefetch=0,
            grid=(G,),
            in_specs=[
                pl.BlockSpec((Bt, 4, HWp), lambda g: (g, 0, 0)),
                pl.BlockSpec((Bt, 4, HWp), lambda g: (g, 0, 0)),
                pl.BlockSpec((Bt, 1, HWp), lambda g: (g, 0, 0)),
            ],
            out_specs=pl.BlockSpec((1, Bt, 2), lambda g: (g, 0, 0)),
        ),
        compiler_params=pltpu.CompilerParams(
            dimension_semantics=("parallel",)),
    )(prd, tar, mask)

    # Glue: per-sample division + batch mean (B scalars; matches the torch
    # forward exactly -- including the degenerate all-zero-indicator case).
    sums = sums.reshape(Bp, 2)[:B]
    per_sample = sums[:, 0] / sums[:, 1]
    return jnp.mean(per_sample)


if __name__ == "__main__":
    key = jax.random.PRNGKey(0)
    k1, k2, k3 = jax.random.split(key, 3)

    B, H, W = 2, 16, 16
    # Positive L,T,R,B distances so IoU is well-defined where ifunc is true.
    loc_prd = jax.random.uniform(k1, (B, 4, H, W), jnp.float32, 0.1, 1.0)
    loc_tar = jax.random.uniform(k2, (B, 4, H, W), jnp.float32, 0.1, 1.0)
    ifunc = jax.random.bernoulli(k3, 0.5, (B, H, W))   # bool indicator

    out = loc_loss(loc_prd, loc_tar, ifunc)
    jax.block_until_ready(out)

    # Pure-JAX reference mirroring the torch module.
    lt, tt, rt, bt = loc_tar[:, 0], loc_tar[:, 1], loc_tar[:, 2], loc_tar[:, 3]
    lp, tp, rp, bp = loc_prd[:, 0], loc_prd[:, 1], loc_prd[:, 2], loc_prd[:, 3]
    tar_a = (tt + bt) * (lt + rt)
    prd_a = (tp + bp) * (lp + rp)
    ih = jnp.minimum(tp, tt) + jnp.minimum(bp, bt)
    iw = jnp.minimum(lp, lt) + jnp.minimum(rp, rt)
    inter = ih * iw
    union = tar_a + prd_a - inter
    iou = inter / union
    iou_l = jnp.where(ifunc, -jnp.log(iou), 0.0)
    ref = jnp.mean(jnp.sum(iou_l, axis=(1, 2)) / jnp.sum(ifunc, axis=(1, 2)))

    assert jnp.allclose(out, ref, rtol=1e-5, atol=1e-5), (out, ref)
    print("KERNEL_OK")
</pallas_src>

<mosaic_0001>
module attributes {stable_mosaic.version = 11 : i64} {
  func.func @_loc_loss_kernel(%arg0: i32, %arg1: memref<1x4x256xf32, #tpu.memory_space<vmem>>, %arg2: memref<1x4x256xf32, #tpu.memory_space<vmem>>, %arg3: memref<1x1x256xf32, #tpu.memory_space<vmem>>, %arg4: memref<1x1x2xf32, #tpu.memory_space<vmem>>) attributes {dimension_semantics = [#tpu.dimension_semantics<parallel>], iteration_bounds = array<i64: 2>, scalar_prefetch = 0 : i64, scratch_operands = 0 : i64, tpu.core_type = #tpu.core_type<tc>, window_params = [{transform_indices = @transform_0, window_bounds = array<i64: 1, 4, 256>}, {transform_indices = @transform_1, window_bounds = array<i64: 1, 4, 256>}, {transform_indices = @transform_2, window_bounds = array<i64: 1, 1, 256>}, {transform_indices = @transform_3, window_bounds = array<i64: 1, 1, 2>}]} {
    %c0 = arith.constant 0 : index
    %c0_0 = arith.constant 0 : index
    %c0_1 = arith.constant 0 : index
    %0 = vector.load %arg1[%c0, %c0_0, %c0_1] : memref<1x4x256xf32, #tpu.memory_space<vmem>>, vector<1x4x256xf32>
    %c0_2 = arith.constant 0 : index
    %c0_3 = arith.constant 0 : index
    %c0_4 = arith.constant 0 : index
    %1 = vector.load %arg2[%c0_2, %c0_3, %c0_4] : memref<1x4x256xf32, #tpu.memory_space<vmem>>, vector<1x4x256xf32>
    %c0_5 = arith.constant 0 : index
    %c0_6 = arith.constant 0 : index
    %c0_7 = arith.constant 0 : index
    %2 = vector.load %arg3[%c0_5, %c0_6, %c0_7] : memref<1x1x256xf32, #tpu.memory_space<vmem>>, vector<1x1x256xf32>
    %3 = vector.shape_cast %2 : vector<1x1x256xf32> to vector<1x256xf32>
    %4 = vector.extract_strided_slice %1 {offsets = [0, 0, 0], sizes = [1, 1, 256], strides = [1, 1, 1]} : vector<1x4x256xf32> to vector<1x1x256xf32>
    %5 = vector.shape_cast %4 : vector<1x1x256xf32> to vector<1x256xf32>
    %6 = vector.extract_strided_slice %1 {offsets = [0, 1, 0], sizes = [1, 1, 256], strides = [1, 1, 1]} : vector<1x4x256xf32> to vector<1x1x256xf32>
    %7 = vector.shape_cast %6 : vector<1x1x256xf32> to vector<1x256xf32>
    %8 = vector.extract_strided_slice %1 {offsets = [0, 2, 0], sizes = [1, 1, 256], strides = [1, 1, 1]} : vector<1x4x256xf32> to vector<1x1x256xf32>
    %9 = vector.shape_cast %8 : vector<1x1x256xf32> to vector<1x256xf32>
    %10 = vector.extract_strided_slice %1 {offsets = [0, 3, 0], sizes = [1, 1, 256], strides = [1, 1, 1]} : vector<1x4x256xf32> to vector<1x1x256xf32>
    %11 = vector.shape_cast %10 : vector<1x1x256xf32> to vector<1x256xf32>
    %12 = vector.extract_strided_slice %0 {offsets = [0, 0, 0], sizes = [1, 1, 256], strides = [1, 1, 1]} : vector<1x4x256xf32> to vector<1x1x256xf32>
    %13 = vector.shape_cast %12 : vector<1x1x256xf32> to vector<1x256xf32>
    %14 = vector.extract_strided_slice %0 {offsets = [0, 1, 0], sizes = [1, 1, 256], strides = [1, 1, 1]} : vector<1x4x256xf32> to vector<1x1x256xf32>
    %15 = vector.shape_cast %14 : vector<1x1x256xf32> to vector<1x256xf32>
    %16 = vector.extract_strided_slice %0 {offsets = [0, 2, 0], sizes = [1, 1, 256], strides = [1, 1, 1]} : vector<1x4x256xf32> to vector<1x1x256xf32>
    %17 = vector.shape_cast %16 : vector<1x1x256xf32> to vector<1x256xf32>
    %18 = vector.extract_strided_slice %0 {offsets = [0, 3, 0], sizes = [1, 1, 256], strides = [1, 1, 1]} : vector<1x4x256xf32> to vector<1x1x256xf32>
    %19 = vector.shape_cast %18 : vector<1x1x256xf32> to vector<1x256xf32>
    %20 = arith.addf %7, %11 : vector<1x256xf32>
    %21 = arith.addf %5, %9 : vector<1x256xf32>
    %22 = arith.mulf %20, %21 : vector<1x256xf32>
    %23 = arith.addf %15, %19 : vector<1x256xf32>
    %24 = arith.addf %13, %17 : vector<1x256xf32>
    %25 = arith.mulf %23, %24 : vector<1x256xf32>
    %26 = arith.minimumf %15, %7 : vector<1x256xf32>
    %27 = arith.minimumf %19, %11 : vector<1x256xf32>
    %28 = arith.addf %26, %27 : vector<1x256xf32>
    %29 = arith.minimumf %13, %5 : vector<1x256xf32>
    %30 = arith.minimumf %17, %9 : vector<1x256xf32>
    %31 = arith.addf %29, %30 : vector<1x256xf32>
    %32 = arith.mulf %28, %31 : vector<1x256xf32>
    %33 = arith.addf %22, %25 : vector<1x256xf32>
    %34 = arith.subf %33, %32 : vector<1x256xf32>
    %cst = arith.constant 0.000000e+00 : f32
    %35 = vector.broadcast %cst : f32 to vector<1x256xf32>
    %36 = arith.cmpf ogt, %3, %35 : vector<1x256xf32>
    %cst_8 = arith.constant 1.000000e+00 : f32
    %37 = vector.broadcast %cst_8 : f32 to vector<1x256xf32>
    %38 = arith.select %36, %32, %37 : vector<1x256xi1>, vector<1x256xf32>
    %cst_9 = arith.constant 1.000000e+00 : f32
    %39 = vector.broadcast %cst_9 : f32 to vector<1x256xf32>
    %40 = arith.select %36, %34, %39 : vector<1x256xi1>, vector<1x256xf32>
    %41 = math.log %40 : vector<1x256xf32>
    %42 = math.log %38 : vector<1x256xf32>
    %43 = arith.subf %41, %42 : vector<1x256xf32>
    %44 = arith.mulf %3, %43 : vector<1x256xf32>
    %cst_10 = arith.constant dense<0.000000e+00> : vector<1xf32>
    %45 = vector.multi_reduction <add>, %44, %cst_10 [1] : vector<1x256xf32> to vector<1xf32>
    %46 = vector.shape_cast %45 : vector<1xf32> to vector<1x1xf32>
    %cst_11 = arith.constant dense<0.000000e+00> : vector<1xf32>
    %47 = vector.multi_reduction <add>, %3, %cst_11 [1] : vector<1x256xf32> to vector<1xf32>
    %48 = vector.shape_cast %47 : vector<1xf32> to vector<1x1xf32>
    %49 = tpu.concatenate %46, %48 in 1 : vector<1x1xf32>, vector<1x1xf32> -> vector<1x2xf32>
    %c0_12 = arith.constant 0 : index
    %c0_13 = arith.constant 0 : index
    %c0_14 = arith.constant 0 : index
    %50 = vector.load %arg4[%c0_12, %c0_13, %c0_14] : memref<1x1x2xf32, #tpu.memory_space<vmem>>, vector<1x1x2xf32>
    %51 = vector.shape_cast %50 : vector<1x1x2xf32> to vector<1x2xf32>
    %52 = vector.shape_cast %49 : vector<1x2xf32> to vector<1x1x2xf32>
    tpu.vector_store %arg4[%c0_12, %c0_13, %c0_14], %52 {strides = array<i32>} : memref<1x1x2xf32, #tpu.memory_space<vmem>>, vector<1x1x2xf32>,
    return
  }
  func.func @transform_0(%arg0: i32) -> (i32, i32, i32) {
    %c0_i32 = arith.constant 0 : i32
    %c0_i32_0 = arith.constant 0 : i32
    %c0_i32_1 = arith.constant 0 : i32
    return %arg0, %c0_i32, %c0_i32_0 : i32, i32, i32
  }
  func.func @transform_1(%arg0: i32) -> (i32, i32, i32) {
    %c0_i32 = arith.constant 0 : i32
    %c0_i32_0 = arith.constant 0 : i32
    %c0_i32_1 = arith.constant 0 : i32
    return %arg0, %c0_i32, %c0_i32_0 : i32, i32, i32
  }
  func.func @transform_2(%arg0: i32) -> (i32, i32, i32) {
    %c0_i32 = arith.constant 0 : i32
    %c0_i32_0 = arith.constant 0 : i32
    %c0_i32_1 = arith.constant 0 : i32
    return %arg0, %c0_i32, %c0_i32_0 : i32, i32, i32
  }
  func.func @transform_3(%arg0: i32) -> (i32, i32, i32) {
    %c0_i32 = arith.constant 0 : i32
    %c0_i32_0 = arith.constant 0 : i32
    %c0_i32_1 = arith.constant 0 : i32
    return %arg0, %c0_i32, %c0_i32_0 : i32, i32, i32
  }
}

</mosaic_0001>

<bundles_post_ra>
// kernel: tpu_custom_call.1
= control target key start
LH: loop header
LB: loop body
LE: loop exit
PB: predicated region body
PF: predicated region fallthrough
CT: control target
= control target key end

     0   :  { %s968_s0 = inlined_call_operand.hbm [shape: f32[2,4,256], index: 0, kind: input, shape index: {}]   ;;  %s969_s1 = inlined_call_operand.hbm [shape: f32[2,4,256], index: 1, kind: input, shape index: {}]   ;;  %s970_s2 = inlined_call_operand.hbm [shape: f32[2,1,256], index: 2, kind: input, shape index: {}]   ;;  %s971_s3 = inlined_call_operand.hbm [shape: f32[2,1,2], index: 3, kind: output, shape index: {}]  }
   0x1   :  { %975 = sst [smem:[#allocation13_spill]] %s968_s0 }
   0x2   :  { %976 = sst [smem:[#allocation14_spill]] %s969_s1 }
   0x3   :  { %8 = vsyncpa [#allocation3], 0 }
   0x4   :  { %10 = vsyncpa [#allocation3 + $0x1], 0 }
   0x5   :  { %11 = vsyncpa [#allocation6], 0 }
   0x6   :  { %13 = vsyncpa [#allocation6 + $0x1], 0 }
   0x7   :  { %14 = vsyncpa [#allocation4], 0 }
   0x8   :  { %16 = vsyncpa [#allocation4 + $0x1], 0  ;;  %s759_s12 = smov 0   ;;  %s761_s13 = smov 0  }
   0x9   :  { %s763_s14 = smov 0   ;;  %s765_s15 = smov 0  }
   0xa LB: > { %s780_s16 = sadd.s32 4294967295, %s732_s15   ;;  %s494_s17 = sadd.s32 4294967294, %s732_s15   ;;  %s732_s15 = sphi %s765_s15, %s997_s15   ;;  %s728_s14 = sphi %s763_s14, %s996_s14   ;;  %s724_s13 = sphi %s761_s13, %s995_s13   ;;  %s720_s12 = sphi %s759_s12, %s994_s12  }
   0xb   : > { %s784_s18 = sadd.s32 1, %s732_s15   ;;  %s29_s19 = sadd.s32 1, %s728_s14 }
   0xc   : > { %s26_s20 = ssub.s32 %s732_s15, %s784_s18  ;;  %p36_p0 = scmp.ne.s32.totalorder %s728_s14, %s724_s13 }
   0xd   : > { %p27_p1 = scmp.eq.s32.totalorder %s26_s20, 0  ;;  %p37_p2 = scmp.eq.s32.totalorder %s732_s15, 0 }
   0xe   : > { %p42_p3 = scmp.ne.s32.totalorder %s724_s13, %s720_s12  ;;  %p43_p4 = scmp.eq.s32.totalorder %s780_s16, 0 }
   0xf   : > { %s796_s21 = scalar_select %p27_p1, %s728_s14, %s29_s19  }
  0x10   : > { %p38_p5 = por %p37_p2, %p36_p0  ;;  %p798_p6 = por %p43_p4, %p42_p3 }
  0x11   : > { %977 = sst [smem:[#allocation12_spill]] %s796_s21  ;;  %p118_p7 = scmp.eq.s32.totalorder %s780_s16, 1 }
  0x12   : > { %s978_s22 = scalar_select %p798_p6, 1, 0 }
  0x13   : > { %p124_p8 = scmp.eq.s32.totalorder %s494_s17, 1  ;;  %p541_p10 = scmp.lt.s32.totalorder %s732_s15, 2 }
  0x14   : > { %p805_p11 = por %p118_p7, %p36_p0  ;;  %s814_s25 = sand.u32 1, %s728_s14  }
  0x15   : > { %p809_p12 = por %p124_p8, %p42_p3  ;;  %s516_s26 = sshll.u32 %s732_s15, 7 }
  0x16   : > { %s979_s23 = scalar_select %p805_p11, 1, 0 }
  0x17   : > { %s980_s24 = scalar_select %p809_p12, 1, 0 }
  0x18   : > { %s972_s27 = sshll.u32 %s814_s25, 3  ;;  %p818_p13 = pnand %p541_p10, %p38_p5 }
  0x19   : > { %s163_s29 = sand.u32 1, %s732_s15   ;;  %s982_s1 = sld [smem:[#allocation14_spill]] }
  0x1a   : > { %s167_s6 = scalar_lea.vmem [#allocation5], %s972_s27  ;;  %s833_s8 = scalar_lea.sflag [#allocation6], %s163_s29 }
  0x1b   : > { %s175_s7 = sshll.u32 %s167_s6, 4  ;;  %p839_p2 = pneg %p818_p13  ;;  %s176_s7 = int_to_ptr.vmem [resolvable:$true] %s175_s7 }
  0x1f   : > { %s828_s5 = scalar_lea.hbm %s982_s1, %s516_s26  ;;  %s585_s19 = scalar_lea.hbm %s982_s1, 256 }
  0x20   : > { %s580_s9 = scalar_lea.hbm %s828_s5, 128  ;;  %p586_p5 = scmp.lt.s32.totalorder %s828_s5, %s982_s1 }
  0x21   : > { %p581_p1 = scmp.ne.s32.totalorder %s828_s5, %s580_s9  ;;  %p587_p7 = scmp.lt.s32.totalorder %s585_s19, %s580_s9 }
  0x23   : > { %p583_p3 = pnand %p839_p2, %p581_p1  ;;  %p588_p8 = por %p587_p7, %p586_p5 }
  0x25   : > { %p584_p4 = pneg %p583_p3 }
  0x27   : > { %p589_p10 = pnand %p588_p8, %p584_p4 }
  0x29   : > { %592 = shalt.err (!%p589_p10)
}
  0x2a   : > { %s593_s29 = scalar_lea.vmem %s176_s7, 128  ;;  %s734_s4 = smov [#allocation5]  }
  0x2b   : > { %p594_p9 = scmp.ne.s32.totalorder %s176_s7, %s593_s29  ;;  %s598_s6 = sshll.u32 %s734_s4, 4  ;;  %s599_s6 = int_to_ptr.vmem [resolvable:$false] %s598_s6 }
  0x2c   : > { %s600_s27 = scalar_lea.vmem %s599_s6, 256  ;;  %p601_p1 = scmp.lt.s32.totalorder %s176_s7, %s599_s6 }
  0x2d   : > { %p596_p0 = pnand %p594_p9, %p839_p2  ;;  %p602_p3 = scmp.lt.s32.totalorder %s600_s27, %s593_s29 }
  0x2f   : > { %p597_p12 = pneg %p596_p0  ;;  %p603_p11 = por %p602_p3, %p601_p1 }
  0x31   : > { %p604_p6 = pnand %p603_p11, %p597_p12 }
  0x33   : > { %607 = shalt.err (!%p604_p6)
}
  0x34   : > { %533 = dma.hbm_to_vmem [thread:$0]  (!%p818_p13), %s828_s5, 128, %s176_s7, %s833_s8  }
  0x35   : > { %p199_p9 = scmp.lt.s32.totalorder %s732_s15, 3  ;;  %s984_s0 = sld [smem:[#allocation13_spill]] }
  0x36   : > { %p985_p6 = scmp.ge.s32.totalorder %s732_s15, 1  ;;  %s987_s19 = sshll.u32 %s814_s25, 3 }
  0x37   : > { %s148_s20 = scalar_lea.vmem [#allocation2], %s987_s19  ;;  %s503_s5 = sshll.u32 %s814_s25, 1 }
  0x38   : > { %p868_p11 = pnand %p985_p6, %p199_p9  ;;  %s156_s30 = sshll.u32 %s148_s20, 4  ;;  %s157_s30 = int_to_ptr.vmem [resolvable:$true] %s156_s30 }
  0x39   : > { %s145_s7 = scalar_lea.sflag [#allocation3], %s814_s25 }
  0x3a   : > { %s986_s17 = scalar_select %p868_p11, 1, 0 }
  0x3b   : > { %s864_s27 = scalar_lea.hbm %s984_s0, %s516_s26  ;;  %s613_s6 = scalar_lea.hbm %s984_s0, 256 }
  0x3c   : > { %s608_s29 = scalar_lea.hbm %s864_s27, 128  ;;  %p614_p5 = scmp.lt.s32.totalorder %s864_s27, %s984_s0 }
  0x3d   : > { %p609_p12 = scmp.ne.s32.totalorder %s864_s27, %s608_s29  ;;  %p615_p7 = scmp.lt.s32.totalorder %s613_s6, %s608_s29 }
  0x3f   : > { %p611_p0 = pnand %p609_p12, %p839_p2  ;;  %p616_p8 = por %p615_p7, %p614_p5 }
  0x41   : > { %p612_p4 = pneg %p611_p0 }
  0x43   : > { %p617_p10 = pnand %p616_p8, %p612_p4 }
  0x45   : > { %620 = shalt.err (!%p617_p10)
}
  0x46   : > { %s621_s19 = scalar_lea.vmem %s157_s30, 128  ;;  %s735_s25 = smov [#allocation2]  }
  0x47   : > { %p622_p1 = scmp.ne.s32.totalorder %s157_s30, %s621_s19  ;;  %s626_s20 = sshll.u32 %s735_s25, 4  ;;  %s627_s20 = int_to_ptr.vmem [resolvable:$false] %s626_s20 }
  0x48   : > { %s628_s1 = scalar_lea.vmem %s627_s20, 256  ;;  %p629_p6 = scmp.lt.s32.totalorder %s157_s30, %s627_s20 }
  0x49   : > { %p624_p3 = pnand %p622_p1, %p839_p2  ;;  %p630_p12 = scmp.lt.s32.totalorder %s628_s1, %s621_s19 }
  0x4b   : > { %p625_p9 = pneg %p624_p3  ;;  %p631_p0 = por %p630_p12, %p629_p6 }
  0x4d   : > { %p632_p11 = pnand %p631_p0, %p625_p9 }
  0x4f   : > { %635 = shalt.err (!%p632_p11)
}
  0x50   : > { %530 = dma.hbm_to_vmem [thread:$0]  (!%p818_p13), %s864_s27, 128, %s157_s30, %s145_s7  }
  0x51   : > { %s518_s29 = sshll.u32 %s732_s15, 5  ;;  %s186_s9 = scalar_lea.vmem [#allocation7], %s503_s5 }
  0x52   : > { %s192_s6 = scalar_lea.hbm %s970_s2, %s518_s29  ;;  %s194_s11 = sshll.u32 %s186_s9, 4  ;;  %s195_s11 = int_to_ptr.vmem [resolvable:$true] %s194_s11 }
  0x53   : > { %s636_s25 = scalar_lea.hbm %s192_s6, 32  ;;  %s641_s20 = scalar_lea.hbm %s970_s2, 64 }
  0x54   : > { %p637_p4 = scmp.ne.s32.totalorder %s192_s6, %s636_s25  ;;  %p642_p11 = scmp.lt.s32.totalorder %s192_s6, %s970_s2 }
  0x55   : > { %p643_p8 = scmp.lt.s32.totalorder %s641_s20, %s636_s25 }
  0x56   : > { %p639_p5 = pnand %p637_p4, %p839_p2 }
  0x57   : > { %p644_p10 = por %p643_p8, %p642_p11 }
  0x58   : > { %p640_p7 = pneg %p639_p5 }
  0x5a   : > { %p645_p1 = pnand %p644_p10, %p640_p7 }
  0x5c   : > { %648 = shalt.err (!%p645_p1)
}
  0x5d   : > { %s649_s27 = scalar_lea.vmem %s195_s11, 32  ;;  %s736_s30 = smov [#allocation7]  }
  0x5e   : > { %p650_p3 = scmp.ne.s32.totalorder %s195_s11, %s649_s27  ;;  %s654_s5 = sshll.u32 %s736_s30, 4  ;;  %s655_s5 = int_to_ptr.vmem [resolvable:$false] %s654_s5 }
  0x5f   : > { %s656_s7 = scalar_lea.vmem %s655_s5, 64  ;;  %p657_p12 = scmp.lt.s32.totalorder %s195_s11, %s655_s5 }
  0x60   : > { %p652_p9 = pnand %p650_p3, %p839_p2  ;;  %p658_p0 = scmp.lt.s32.totalorder %s656_s7, %s649_s27 }
  0x62   : > { %p653_p6 = pneg %p652_p9  ;;  %p659_p4 = por %p658_p0, %p657_p12 }
  0x64   : > { %p660_p5 = pnand %p659_p4, %p653_p6 }
  0x66   : > { %663 = shalt.err (!%p660_p5)
}
  0x67   : > { %536 = dma.hbm_to_vmem [thread:$0]  (!%p818_p13), %s192_s6, 32, %s195_s11, %s833_s8  }
  0x68   : > { %p988_p7 = scmp.ne.s32.totalorder %s986_s17, 0 }
  0x69   : > { %s912_s0 = sand.u32 (!%p988_p7), 1, %s724_s13   ;;  %p989_p2 = scmp.ne.s32.totalorder (!%p988_p7), %s978_s22, 0 }
  0x6a   : > { %203 = sbr.rel (%p988_p7) target bundleno = 316 (0x13c), region = 32  ;;  %s507_s21 = sshll.u32 (!%p988_p7), %s912_s0, 3 }
  0x6b   : > { %s206_s10 = scalar_lea.sflag (!%p988_p7), [#allocation3], %s912_s0  ;;  %s209_s29 = scalar_lea.vmem (!%p988_p7), [#allocation2], %s507_s21 }
  0x6f   : > { %707 = dma.done.wait (%p989_p2), %s206_s10, 128  }
  0x70   : > { %709 = vsyncadd (%p989_p2), %s206_s10, 4294967168  ;;  %s214_s28 = sand.u32 1, %s780_s16   ;;  %s218_s17 = scalar_lea.vmem [#allocation5], %s507_s21 }
  0x71   : > { %s215_s8 = scalar_lea.sflag [#allocation6], %s214_s28 }
  0x72   : > { %711 = dma.done.wait (%p989_p2), %s215_s8, 160  }
  0x73   : > { %713 = vsyncadd (%p989_p2), %s215_s8, 4294967136  ;;  %v297_v0 = vlaneseq  ;;  %v737_v1 = vmov 1966171168   ;;  %v259_v3 = vld [vmem:[%s209_s29] sm:$0xff]  ;;  %v260_v4 = vld [vmem:[%s218_s17] sm:$0xff]  ;;  %s509_s26 = sshll.u32 %s912_s0, 1 }
  0x74   : > { %v295_v2 = vunpack.c.l.s4 %v737_v1  ;;  %v510_v5 = vrot.slane %v260_v4, 10  ;;  %v511_v6 = vrot.slane %v259_v3, 10  ;;  %v280_v7 = vmin.f32 %v259_v3, %v260_v4  ;;  %s227_s22 = scalar_lea.vmem [#allocation7], %s509_s26  ;;  %s513_s4 = sshll.u32 %s780_s16, 4 }
  0x75   : > { %v298_v8 = vshrl.u32 %v297_v0, 7  ;;  %v261_v22 = vld [vmem:[%s227_s22] sm:$0x3]  ;;  %vm346_vm1 = vcmask 1040384   ;;  %s258_s6 = scalar_lea.vmem [#allocation8], %s912_s0  ;;  %vm368_vm2 = vcmask 7168   ;;  %s931_s1 = scalar_lea.hbm %s971_s3, %s513_s4 }
  0x76   : > { %v266_v9 = vadd.f32 %v510_v5, %v260_v4  ;;  %v275_v10 = vadd.f32 %v511_v6, %v259_v3  ;;  %v512_v11 = vrot.slane %v280_v7, 10  ;;  %v296_v12 = vunpack.c.0.s8 %v295_v2  ;;  %s385_s9 = sshll.u32 %s258_s6, 4  ;;  %s373_s19 = scalar_lea.sflag [#allocation4], %s912_s0  ;;  %s386_s9 = int_to_ptr.vmem [resolvable:$true] %s385_s9 }
  0x77   : > { %vm292_vm0 = vcmp.gt.f32.partialorder %v261_v22, 0.0  ;;  %v338_v37 = vsub.s32 0, %v298_v8  ;;  %v342_v38 = vsub.s32 1, %v298_v8  ;;  %vm370_vm3 = vcmask 8192   ;;  %s664_s20 = scalar_lea.vmem %s386_s9, 16  ;;  %p990_p11 = scmp.ne.s32.totalorder %s979_s23, 0 }
  0x78   : > { %v268_v13 = vrot.slane %v266_v9, 7  ;;  %v277_v14 = vrot.slane %v275_v10, 7  ;;  %v285_v15 = vadd.f32 %v512_v11, %v280_v7  ;;  %v299_v19 = vsub.s32 %v296_v12, %v298_v8  ;;  %p665_p13 = scmp.ne.s32.totalorder %s386_s9, %s664_s20  ;;  %s738_s16 = smov [#allocation8]  }
  0x79   : > { %v356_v40 = vrot.slane %v261_v22, %v338_v37  ;;  %v360_v41 = vrot.slane %v261_v22, %v342_v38  ;;  %s668_s27 = sshll.u32 %s738_s16, 4  ;;  %s669_s27 = int_to_ptr.vmem [resolvable:$false] %s668_s27 }
  0x7a   : > { %v270_v16 = vmul.f32 %v268_v13, %v266_v9  ;;  %v279_v17 = vmul.f32 %v277_v14, %v275_v10  ;;  %v287_v18 = vrot.slane %v285_v15, 7  ;;  %p666_p8 = pnand %p665_p13, %p990_p11  ;;  %s670_s30 = scalar_lea.vmem %s669_s27, 32 }
  0x7b   : > { %v363_v46 = vsel %vm346_vm1, %v356_v40, 0.0  ;;  %v364_v47 = vsel %vm346_vm1, %v360_v41, 0.0  ;;  %p671_p1 = scmp.lt.s32.totalorder %s386_s9, %s669_s27  ;;  %p672_p3 = scmp.lt.s32.totalorder %s670_s30, %s664_s20 }
  0x7c   : > { %v289_v20 = vmul.f32 %v287_v18, %v285_v15  ;;  %v290_v21 = vadd.f32 %v279_v17, %v270_v16  ;;  %v365_v49 = vadd.f32 %v364_v47, %v363_v46  ;;  %p667_p10 = pneg %p666_p8 }
  0x7d   : > { %p673_p9 = por %p672_p3, %p671_p1 }
  0x7e   : > { %v291_v23 = vsub.f32 %v290_v21, %v289_v20  ;;  %v300_v24 = vrot.slane %v289_v20, %v299_v19 }
  0x7f   : > { %p674_p6 = pnand %p673_p9, %p667_p10 }
  0x80   : > { %v301_v25 = vcombine.high %v300_v24, %v300_v24  ;;  %v318_v26 = vrot.slane %v291_v23, %v299_v19 }
  0x82   : > { %v308_v27 = vrot.slane %v301_v25, %v299_v19  ;;  %v319_v28 = vcombine.high %v318_v26, %v318_v26 }
  0x84   : > { %v310_v29 = vsel %vm292_vm0, %v308_v27, 1.0  ;;  %v326_v30 = vrot.slane %v319_v28, %v299_v19 }
  0x85   : > { %576 = vlog2.f32 %v310_v29 }
  0x86   : > { %v328_v31 = vsel %vm292_vm0, %v326_v30, 1.0 }
  0x87   : > { %578 = vlog2.f32 %v328_v31 }
  0x92   : > { %v577_v32 = vpop.eup %576 }
  0x93   : > { %v332_v33 = vmul.f32 0.6931472, %v577_v32 }
  0x94   : > { %v579_v34 = vpop.eup %578 }
  0x95   : > { %v330_v35 = vmul.f32 0.6931472, %v579_v34 }
  0x97   : > { %v333_v36 = vsub.f32 %v330_v35, %v332_v33 }
  0x99   : > { %v334_v39 = vmul.f32 %v333_v36, %v261_v22 }
  0x9b   : > { %v339_v42 = vrot.slane %v334_v39, %v338_v37  ;;  %v343_v43 = vrot.slane %v334_v39, %v342_v38 }
  0x9d   : > { %v347_v44 = vsel %vm346_vm1, %v339_v42, 0.0  ;;  %v348_v45 = vsel %vm346_vm1, %v343_v43, 0.0 }
  0x9e   : > { %v349_v48 = vadd.f32 %v348_v45, %v347_v44 }
  0xa0   : > { %350 = vadd.xlane.f32.xlu0 %v349_v48 }
  0xa4   : > { %366 = vadd.xlane.f32.xlu0 %v365_v49 }
 0x129   : > { %v351_v50 = vpop.xlane.xlu0 %350 }
 0x12d   : > { %v367_v51 = vpop.xlane.xlu0 %366 }
 0x12e   : > { %v369_v52 = vsel %vm368_vm2, %v351_v50, %v367_v51 }
 0x12f   : > { %371 = vst.msk [vmem:[%s258_s6] sm:$0x1] %vm370_vm3, %v369_v52 }
 0x130   : > { %677 = shalt.err (!%p674_p6)
}
 0x131   : > { %s678_s5 = scalar_lea.hbm %s931_s1, 16  ;;  %s682_s21 = scalar_lea.hbm %s971_s3, 32 }
 0x132   : > { %p679_p12 = scmp.ne.s32.totalorder %s931_s1, %s678_s5  ;;  %p683_p5 = scmp.lt.s32.totalorder %s931_s1, %s971_s3 }
 0x133   : > { %p684_p7 = scmp.lt.s32.totalorder %s682_s21, %s678_s5 }
 0x134   : > { %p680_p0 = pnand %p679_p12, %p990_p11 }
 0x135   : > { %p685_p2 = por %p684_p7, %p683_p5 }
 0x136   : > { %p681_p4 = pneg %p680_p0 }
 0x138   : > { %p686_p13 = pnand %p685_p2, %p681_p4 }
 0x13a   : > { %689 = shalt.err (!%p686_p13)
}
 0x13b   : > { %525 = dma.vmem_to_hbm [thread:$0]  (%p990_p11), %s386_s9, 16, %s931_s1, %s373_s19  }
 0x13c PF: > { %s397_s28 = sand.u32 1, %s720_s12   ;;  %p991_p8 = scmp.ne.s32.totalorder %s980_s24, 0 }
 0x13d   : > { %p992_p10 = scmp.ge.s32.totalorder %s732_s15, 2  ;;  %s398_s8 = scalar_lea.sflag [#allocation4], %s397_s28 }
 0x13f   : > { %p538_p1 = pnand %p992_p10, %p991_p8 }
 0x141   : > { %p539_p3 = pneg %p538_p1 }
 0x143   : > { %715 = dma.done.wait (%p539_p3), %s398_s8, 16  }
 0x144   : > { %717 = vsyncadd (%p539_p3), %s398_s8, 4294967280  ;;  %s993_s17 = sld [smem:[#allocation12_spill]]  ;;  %p19_p9 = scmp.ge.s32.totalorder %s784_s18, 4  }
 0x145   : > { %s994_s12 = smov %s724_s13  ;;  %s995_s13 = smov %s728_s14 }
 0x146   : > { %s997_s15 = smov %s784_s18  ;;  %21 = sbr.rel (!%p19_p9) target bundleno = 10 (0xa), region = 101 }
 0x14a   : > { %s996_s14 = smov %s993_s17 }
 0x14b   :  { %402 = vsyncpa [#allocation3], 1 }
 0x14c   :  { %404 = vsyncpa [#allocation3 + $0x1], 1 }
 0x14d   :  { %405 = vsyncpa [#allocation6], 1 }
 0x14e   :  { %407 = vsyncpa [#allocation6 + $0x1], 1 }
 0x14f   :  { %408 = vsyncpa [#allocation4], 1 }
 0x150   :  { %410 = vsyncpa [#allocation4 + $0x1], 1 }

</bundles_post_ra>
